<compile_context>
chip_gen: v7x
topology: tpu7x:2x2x1
jax: 0.10.0
libtpu: 0.0.40
codegen_flags: <defaults>
</compile_context>

<pallas_src>
import functools

import jax
import jax.numpy as jnp
from jax import lax
from jax.experimental import pallas as pl
from jax.experimental.pallas import tpu as pltpu


def _topk_kernel(x_ref, o_ref, *, k: int, strip: int):
    """Keep top-k per row of the tile (ReLU'd, in place), zero elsewhere.

    k rounds of (row-max -> one-hot select first occurrence -> write
    ReLU(max) -> mask out selected entry), matching torch.topk's exact-k
    selection with first-index tie breaking.
    """
    tm, D = x_ref.shape
    n_strips = tm // strip
    cdt = x_ref.dtype
    neg_inf = jnp.finfo(cdt).min
    lane_iota = lax.broadcasted_iota(jnp.int32, (strip, D), 1)

    @pl.loop(0, n_strips)
    def _(s):
        r0 = pl.multiple_of(s * strip, strip)
        xw = x_ref[pl.ds(r0, strip), :]                       # (strip, D)
        out = jnp.zeros((strip, D), dtype=cdt)
        # k is a static Python int -> fully unrolled rounds.
        for _ in range(k):
            m = jnp.max(xw, axis=-1, keepdims=True)           # row max
            eq = xw == m                                      # argmax ties
            masked_iota = jnp.where(eq, lane_iota, D)
            first = jnp.min(masked_iota, axis=-1, keepdims=True)
            sel = lane_iota == first                          # one-hot / row
            val = jnp.maximum(m, 0)                           # postact = ReLU
            out = jnp.where(sel, val, out)
            xw = jnp.where(sel, neg_inf, xw)                  # drop selected
        o_ref[pl.ds(r0, strip), :] = out.astype(o_ref.dtype)


def _choose_row_tile(n_rows: int, d: int, itemsize: int) -> int:
    """Largest row tile under a block-buffer budget, keeping >= 2 grid steps."""
    block_budget = 12 * 1024 * 1024            # in+out, double-buffered blocks
    tm = block_budget // (4 * d * itemsize)
    tm = int(max(8, min(tm, 512)))
    tm = (tm // 8) * 8
    n_pad8 = ((n_rows + 7) // 8) * 8
    if tm >= n_pad8:
        # Keep at least 2 grid steps when the row count allows it (v7x 2-TC).
        tm = max(8, ((n_pad8 // 2) // 8) * 8) if n_pad8 >= 16 else n_pad8
    return tm


def topk_activation(x: jax.Array, k: int) -> jax.Array:
    """Pallas TopK activation over the last axis of `x` (ReLU postact)."""
    orig_shape = x.shape
    orig_dtype = x.dtype
    D = orig_shape[-1]
    k = int(max(1, min(int(k), D)))            # guard k > D

    compute_dtype = orig_dtype if jnp.issubdtype(orig_dtype, jnp.floating) \
        else jnp.float32
    # TODO(synk): on v5e, bf16 elementwise compute is emulated; consider an
    # fp32 up-cast there (generation-conditional) when feeding bf16 inputs.

    x2 = x.reshape(-1, D).astype(compute_dtype)
    N = x2.shape[0]
    itemsize = jnp.dtype(compute_dtype).itemsize

    tm = _choose_row_tile(N, D, itemsize)
    strip = 16 if (itemsize == 2 and tm % 16 == 0) else 8

    # Pad rows up to a multiple of tm (never a single monolithic block).
    N_padded = ((N + tm - 1) // tm) * tm
    if N_padded != N:
        x2 = jnp.pad(x2, ((0, N_padded - N), (0, 0)))

    kernel = functools.partial(_topk_kernel, k=k, strip=strip)
    out2 = pl.pallas_call(
        kernel,
        out_shape=jax.ShapeDtypeStruct((N_padded, D), compute_dtype),
        grid_spec=pltpu.PrefetchScalarGridSpec(
            num_scalar_prefetch=0,
            grid=(N_padded // tm,),
            in_specs=[pl.BlockSpec((tm, D), lambda i: (i, 0))],
            out_specs=pl.BlockSpec((tm, D), lambda i: (i, 0)),
        ),
        compiler_params=pltpu.CompilerParams(
            dimension_semantics=("parallel",),
            vmem_limit_bytes=32 * 1024 * 1024,
        ),
    )(x2)

    out2 = out2[:N]
    return out2.reshape(orig_shape).astype(orig_dtype)


def _topk_reference(x: jax.Array, k: int) -> jax.Array:
    """Pure-JAX reference matching the PyTorch forward."""
    vals, idxs = lax.top_k(x, k)                       # along last axis
    vals = jnp.maximum(vals, 0.0)                      # ReLU postact
    result = jnp.zeros_like(x)
    result = jnp.put_along_axis(result, idxs, vals.astype(x.dtype), axis=-1,
                                inplace=False)
    return result


if __name__ == "__main__":
    key = jax.random.PRNGKey(0)
    batch, seq, hidden = 2, 8, 64
    k = 4
    x = jax.random.normal(key, (batch, seq, hidden), dtype=jnp.float32)

    out = topk_activation(x, k)
    out = jax.block_until_ready(out)

    ref = _topk_reference(x, k)
    assert out.shape == x.shape and out.dtype == x.dtype
    assert jnp.allclose(out, ref, atol=1e-6), "mismatch vs reference"

    print("KERNEL_OK")
</pallas_src>

<mosaic_0001>
module attributes {stable_mosaic.version = 11 : i64} {
  func.func @_topk_kernel(%arg0: i32, %arg1: memref<8x64xf32, #tpu.memory_space<vmem>>, %arg2: memref<8x64xf32, #tpu.memory_space<vmem>>) attributes {dimension_semantics = [#tpu.dimension_semantics<parallel>], iteration_bounds = array<i64: 2>, scalar_prefetch = 0 : i64, scratch_operands = 0 : i64, tpu.core_type = #tpu.core_type<tc>, window_params = [{transform_indices = @transform_0, window_bounds = array<i64: 8, 64>}, {transform_indices = @transform_1, window_bounds = array<i64: 8, 64>}]} {
    %0 = tpu.iota {dimensions = array<i32: 1>} : vector<8x64xi32>
    %c0_i32 = arith.constant 0 : i32
    %c1_i32 = arith.constant 1 : i32
    %1 = arith.muli %c0_i32, %c1_i32 : i32
    %c0_i32_0 = arith.constant 0 : i32
    %2 = arith.addi %c0_i32_0, %1 : i32
    %c8_i32 = arith.constant 8 : i32
    %3 = arith.muli %2, %c8_i32 : i32
    %4 = tpu.assume_multiple %3, 8 : i32
    %5 = arith.index_cast %4 : i32 to index
    %c0 = arith.constant 0 : index
    %6 = vector.load %arg1[%5, %c0] : memref<8x64xf32, #tpu.memory_space<vmem>>, vector<8x64xf32>
    %cst = arith.constant 0.000000e+00 : f32
    %7 = vector.broadcast %cst : f32 to vector<8x64xf32>
    %cst_1 = arith.constant dense<0xFF800000> : vector<8xf32>
    %8 = vector.multi_reduction <maximumf>, %6, %cst_1 [1] : vector<8x64xf32> to vector<8xf32>
    %9 = vector.shape_cast %8 : vector<8xf32> to vector<8x1xf32>
    %10 = vector.broadcast %9 : vector<8x1xf32> to vector<8x64xf32>
    %11 = arith.cmpf oeq, %6, %10 : vector<8x64xf32>
    %c64_i32 = arith.constant 64 : i32
    %12 = vector.broadcast %c64_i32 : i32 to vector<8x64xi32>
    %13 = arith.select %11, %0, %12 : vector<8x64xi1>, vector<8x64xi32>
    %cst_2 = arith.constant dense<2147483647> : vector<8xi32>
    %14 = vector.multi_reduction <minsi>, %13, %cst_2 [1] : vector<8x64xi32> to vector<8xi32>
    %15 = vector.shape_cast %14 : vector<8xi32> to vector<8x1xi32>
    %16 = vector.broadcast %15 : vector<8x1xi32> to vector<8x64xi32>
    %17 = arith.cmpi eq, %0, %16 : vector<8x64xi32>
    %cst_3 = arith.constant 0.000000e+00 : f32
    %18 = vector.broadcast %cst_3 : f32 to vector<8x1xf32>
    %19 = arith.maximumf %9, %18 : vector<8x1xf32>
    %20 = vector.shape_cast %19 : vector<8x1xf32> to vector<8x1xf32>
    %21 = vector.broadcast %20 : vector<8x1xf32> to vector<8x64xf32>
    %22 = arith.select %17, %21, %7 : vector<8x64xi1>, vector<8x64xf32>
    %cst_4 = arith.constant -3.40282347E+38 : f32
    %23 = vector.broadcast %cst_4 : f32 to vector<8x64xf32>
    %24 = arith.select %17, %23, %6 : vector<8x64xi1>, vector<8x64xf32>
    %cst_5 = arith.constant dense<0xFF800000> : vector<8xf32>
    %25 = vector.multi_reduction <maximumf>, %24, %cst_5 [1] : vector<8x64xf32> to vector<8xf32>
    %26 = vector.shape_cast %25 : vector<8xf32> to vector<8x1xf32>
    %27 = vector.broadcast %26 : vector<8x1xf32> to vector<8x64xf32>
    %28 = arith.cmpf oeq, %24, %27 : vector<8x64xf32>
    %c64_i32_6 = arith.constant 64 : i32
    %29 = vector.broadcast %c64_i32_6 : i32 to vector<8x64xi32>
    %30 = arith.select %28, %0, %29 : vector<8x64xi1>, vector<8x64xi32>
    %cst_7 = arith.constant dense<2147483647> : vector<8xi32>
    %31 = vector.multi_reduction <minsi>, %30, %cst_7 [1] : vector<8x64xi32> to vector<8xi32>
    %32 = vector.shape_cast %31 : vector<8xi32> to vector<8x1xi32>
    %33 = vector.broadcast %32 : vector<8x1xi32> to vector<8x64xi32>
    %34 = arith.cmpi eq, %0, %33 : vector<8x64xi32>
    %cst_8 = arith.constant 0.000000e+00 : f32
    %35 = vector.broadcast %cst_8 : f32 to vector<8x1xf32>
    %36 = arith.maximumf %26, %35 : vector<8x1xf32>
    %37 = vector.shape_cast %36 : vector<8x1xf32> to vector<8x1xf32>
    %38 = vector.broadcast %37 : vector<8x1xf32> to vector<8x64xf32>
    %39 = arith.select %34, %38, %22 : vector<8x64xi1>, vector<8x64xf32>
    %cst_9 = arith.constant -3.40282347E+38 : f32
    %40 = vector.broadcast %cst_9 : f32 to vector<8x64xf32>
    %41 = arith.select %34, %40, %24 : vector<8x64xi1>, vector<8x64xf32>
    %cst_10 = arith.constant dense<0xFF800000> : vector<8xf32>
    %42 = vector.multi_reduction <maximumf>, %41, %cst_10 [1] : vector<8x64xf32> to vector<8xf32>
    %43 = vector.shape_cast %42 : vector<8xf32> to vector<8x1xf32>
    %44 = vector.broadcast %43 : vector<8x1xf32> to vector<8x64xf32>
    %45 = arith.cmpf oeq, %41, %44 : vector<8x64xf32>
    %c64_i32_11 = arith.constant 64 : i32
    %46 = vector.broadcast %c64_i32_11 : i32 to vector<8x64xi32>
    %47 = arith.select %45, %0, %46 : vector<8x64xi1>, vector<8x64xi32>
    %cst_12 = arith.constant dense<2147483647> : vector<8xi32>
    %48 = vector.multi_reduction <minsi>, %47, %cst_12 [1] : vector<8x64xi32> to vector<8xi32>
    %49 = vector.shape_cast %48 : vector<8xi32> to vector<8x1xi32>
    %50 = vector.broadcast %49 : vector<8x1xi32> to vector<8x64xi32>
    %51 = arith.cmpi eq, %0, %50 : vector<8x64xi32>
    %cst_13 = arith.constant 0.000000e+00 : f32
    %52 = vector.broadcast %cst_13 : f32 to vector<8x1xf32>
    %53 = arith.maximumf %43, %52 : vector<8x1xf32>
    %54 = vector.shape_cast %53 : vector<8x1xf32> to vector<8x1xf32>
    %55 = vector.broadcast %54 : vector<8x1xf32> to vector<8x64xf32>
    %56 = arith.select %51, %55, %39 : vector<8x64xi1>, vector<8x64xf32>
    %cst_14 = arith.constant -3.40282347E+38 : f32
    %57 = vector.broadcast %cst_14 : f32 to vector<8x64xf32>
    %58 = arith.select %51, %57, %41 : vector<8x64xi1>, vector<8x64xf32>
    %cst_15 = arith.constant dense<0xFF800000> : vector<8xf32>
    %59 = vector.multi_reduction <maximumf>, %58, %cst_15 [1] : vector<8x64xf32> to vector<8xf32>
    %60 = vector.shape_cast %59 : vector<8xf32> to vector<8x1xf32>
    %61 = vector.broadcast %60 : vector<8x1xf32> to vector<8x64xf32>
    %62 = arith.cmpf oeq, %58, %61 : vector<8x64xf32>
    %c64_i32_16 = arith.constant 64 : i32
    %63 = vector.broadcast %c64_i32_16 : i32 to vector<8x64xi32>
    %64 = arith.select %62, %0, %63 : vector<8x64xi1>, vector<8x64xi32>
    %cst_17 = arith.constant dense<2147483647> : vector<8xi32>
    %65 = vector.multi_reduction <minsi>, %64, %cst_17 [1] : vector<8x64xi32> to vector<8xi32>
    %66 = vector.shape_cast %65 : vector<8xi32> to vector<8x1xi32>
    %67 = vector.broadcast %66 : vector<8x1xi32> to vector<8x64xi32>
    %68 = arith.cmpi eq, %0, %67 : vector<8x64xi32>
    %cst_18 = arith.constant 0.000000e+00 : f32
    %69 = vector.broadcast %cst_18 : f32 to vector<8x1xf32>
    %70 = arith.maximumf %60, %69 : vector<8x1xf32>
    %71 = vector.shape_cast %70 : vector<8x1xf32> to vector<8x1xf32>
    %72 = vector.broadcast %71 : vector<8x1xf32> to vector<8x64xf32>
    %73 = arith.select %68, %72, %56 : vector<8x64xi1>, vector<8x64xf32>
    %74 = arith.index_cast %4 : i32 to index
    %c0_19 = arith.constant 0 : index
    %75 = vector.load %arg2[%74, %c0_19] : memref<8x64xf32, #tpu.memory_space<vmem>>, vector<8x64xf32>
    tpu.vector_store %arg2[%74, %c0_19], %73 {strides = array<i32>} : memref<8x64xf32, #tpu.memory_space<vmem>>, vector<8x64xf32>,
    %c1_i32_20 = arith.constant 1 : i32
    return
  }
  func.func @transform_0(%arg0: i32) -> (i32, i32) {
    %c0_i32 = arith.constant 0 : i32
    %c0_i32_0 = arith.constant 0 : i32
    return %arg0, %c0_i32 : i32, i32
  }
  func.func @transform_1(%arg0: i32) -> (i32, i32) {
    %c0_i32 = arith.constant 0 : i32
    %c0_i32_0 = arith.constant 0 : i32
    return %arg0, %c0_i32 : i32, i32
  }
}

</mosaic_0001>

<bundles_post_ra>
// kernel: tpu_custom_call.1
= control target key start
LH: loop header
LB: loop body
LE: loop exit
PB: predicated region body
PF: predicated region fallthrough
CT: control target
= control target key end

     0   :  { %6 = vsyncpa [#allocation3], 0  ;;  %s672_s0 = inlined_call_operand.hbm [shape: f32[16,64], index: 0, kind: input, shape index: {}]   ;;  %s673_s1 = inlined_call_operand.hbm [shape: f32[16,64], index: 1, kind: output, shape index: {}]  }
   0x1   :  { %8 = vsyncpa [#allocation3 + $0x1], 0 }
   0x2   :  { %9 = vsyncpa [#allocation4], 0 }
   0x3   :  { %11 = vsyncpa [#allocation4 + $0x1], 0  ;;  %s484_s6 = smov 0   ;;  %s486_s7 = smov 0  }
   0x4   :  { %s488_s8 = smov 0   ;;  %s490_s9 = smov 0  }
   0x5 LB: > { %s505_s10 = sadd.s32 4294967295, %s470_s9   ;;  %s316_s11 = sadd.s32 4294967294, %s470_s9   ;;  %s470_s9 = sphi %s490_s9, %s688_s9   ;;  %s466_s8 = sphi %s488_s8, %s687_s8   ;;  %s462_s7 = sphi %s486_s7, %s686_s7   ;;  %s458_s6 = sphi %s484_s6, %s685_s6  }
   0x6   : > { %s509_s12 = sadd.s32 1, %s470_s9   ;;  %s24_s13 = sadd.s32 1, %s466_s8 }
   0x7   : > { %s21_s14 = ssub.s32 %s470_s9, %s509_s12  ;;  %p31_p0 = scmp.ne.s32.totalorder %s466_s8, %s462_s7 }
   0x8   : > { %p22_p1 = scmp.eq.s32.totalorder %s21_s14, 0  ;;  %p32_p2 = scmp.eq.s32.totalorder %s470_s9, 0 }
   0x9   : > { %p37_p3 = scmp.ne.s32.totalorder %s462_s7, %s458_s6  ;;  %p38_p4 = scmp.eq.s32.totalorder %s505_s10, 0 }
   0xa   : > { %s521_s15 = scalar_select %p22_p1, %s466_s8, %s24_s13  }
   0xb   : > { %p523_p5 = por %p32_p2, %p31_p0  ;;  %p527_p6 = por %p38_p4, %p37_p3 }
   0xc   : > { %p61_p7 = scmp.eq.s32.totalorder %s505_s10, 1  ;;  %p67_p8 = scmp.eq.s32.totalorder %s316_s11, 1 }
   0xd   : > { %p340_p10 = scmp.lt.s32.totalorder %s470_s9, 2  ;;  %s87_s20 = sand.u32 1, %s466_s8  }
   0xe   : > { %p534_p11 = por %p61_p7, %p31_p0  ;;  %p538_p12 = por %p67_p8, %p37_p3 }
   0xf   : > { %s320_s21 = sshll.u32 %s470_s9, 7  ;;  %s319_s22 = sshll.u32 %s87_s20, 3 }
  0x10   : > { %s677_s18 = scalar_select %p534_p11, 1, 0 }
  0x11   : > { %s678_s19 = scalar_select %p538_p12, 1, 0 }
  0x12   : > { %s547_s25 = scalar_lea.hbm %s672_s0, %s320_s21  ;;  %s91_s26 = scalar_lea.vmem [#allocation2], %s319_s22 }
  0x13   : > { %s98_s27 = sshll.u32 %s91_s26, 4  ;;  %p551_p13 = pnand %p340_p10, %p523_p5  ;;  %s555_s27 = int_to_ptr.vmem [resolvable:$true] %s98_s27 }
  0x14   : > { %s88_s29 = scalar_lea.sflag [#allocation3], %s87_s20  ;;  %s374_s30 = scalar_lea.hbm %s547_s25, 128 }
  0x15   : > { %p375_p2 = scmp.ne.s32.totalorder %s547_s25, %s374_s30  ;;  %p376_p3 = pneg %p551_p13 }
  0x16   : > { %s379_s4 = scalar_lea.hbm %s672_s0, 256  ;;  %p380_p5 = scmp.lt.u32.totalorder %s547_s25, %s672_s0 }
  0x17   : > { %p377_p4 = pnand %p376_p3, %p375_p2  ;;  %p381_p8 = scmp.lt.u32.totalorder %s379_s4, %s374_s30 }
  0x18   : > { %p383_p9 = scmp.lt.u32.totalorder %s374_s30, %s547_s25 }
  0x19   : > { %p378_p7 = pneg %p377_p4  ;;  %p382_p10 = por %p381_p8, %p380_p5 }
  0x1b   : > { %p384_p0 = por %p383_p9, %p382_p10 }
  0x1d   : > { %p385_p1 = pnand %p384_p0, %p378_p7 }
  0x1f   : > { %388 = shalt.err (!%p385_p1)
}
  0x20   : > { %s389_s13 = scalar_lea.vmem %s555_s27, 128  ;;  %s472_s14 = smov [#allocation2]  }
  0x21   : > { %p390_p2 = scmp.ne.s32.totalorder %s555_s27, %s389_s13  ;;  %s394_s16 = sshll.u32 %s472_s14, 4  ;;  %s395_s16 = int_to_ptr.vmem [resolvable:$false] %s394_s16 }
  0x22   : > { %s396_s20 = scalar_lea.vmem %s395_s16, 256  ;;  %p397_p11 = scmp.lt.s32.totalorder %s555_s27, %s395_s16 }
  0x23   : > { %p392_p4 = pnand %p390_p2, %p376_p3  ;;  %p398_p5 = scmp.lt.s32.totalorder %s396_s20, %s389_s13 }
  0x25   : > { %p393_p12 = pneg %p392_p4  ;;  %p399_p8 = por %p398_p5, %p397_p11 }
  0x27   : > { %p400_p9 = pnand %p399_p8, %p393_p12 }
  0x29   : > { %403 = shalt.err (!%p400_p9)
}
  0x2a   : > { %335 = dma.hbm_to_vmem [thread:$0]  (!%p551_p13), %s547_s25, 128, %s555_s27, %s88_s29  }
  0x2b   : > { %p680_p0 = scmp.lt.s32.totalorder %s470_s9, 3  ;;  %p681_p1 = scmp.ge.s32.totalorder %s470_s9, 1 }
  0x2d   : > { %p104_p3 = pnand %p681_p1, %p680_p0 }
  0x2e   : > { %s589_s21 = sand.u32 (!%p104_p3), 1, %s462_s7  }
  0x2f   : > { %107 = sbr.rel (%p104_p3) target bundleno = 1838 (0x72e), region = 24  ;;  %s322_s22 = sshll.u32 (!%p104_p3), %s589_s21, 3 }
  0x30   : > { %s110_s23 = scalar_lea.sflag (!%p104_p3), [#allocation3], %s589_s21  ;;  %s113_s24 = scalar_lea.vmem (!%p104_p3), [#allocation2], %s322_s22 }
  0x36   : > { %449 = dma.done.wait (%p527_p6), %s110_s23, 128  }
  0x37   : > { %451 = vsyncadd (%p527_p6), %s110_s23, 4294967168  ;;  %vm135_vm0 = vcmask 523264   ;;  %v134_v0 = vld [vmem:[%s113_s24] sm:$0xff]  ;;  %v132_v2 = vlaneseq  ;;  %s325_s17 = sshll.u32 %s505_s10, 7  ;;  %s131_s25 = scalar_lea.vmem [#allocation5], %s322_s22 }
  0x38   : > { %v136_v1 = vsel %vm135_vm0, %v134_v0, -inf  ;;  %s246_s26 = sshll.u32 %s131_s25, 4  ;;  %s627_s29 = scalar_lea.hbm %s673_s1, %s325_s17  ;;  %s629_s26 = int_to_ptr.vmem [resolvable:$true] %s246_s26 }
  0x39   : > { %137 = vmax.xlane.f32.xlu0 %v136_v1  ;;  %v600_v3 = vand.u32 127, %v132_v2  ;;  %s233_s10 = scalar_lea.sflag [#allocation4], %s589_s21  ;;  %s404_s30 = scalar_lea.vmem %s629_s26, 128 }
  0x3a   : > { %p405_p6 = scmp.ne.s32.totalorder %s629_s26, %s404_s30  ;;  %p682_p11 = scmp.ne.s32.totalorder %s677_s18, 0 }
  0x3b   : > { %s473_s2 = smov [#allocation5]  }
  0x3c   : > { %p406_p12 = pnand %p405_p6, %p682_p11  ;;  %s408_s3 = sshll.u32 %s473_s2, 4  ;;  %s409_s3 = int_to_ptr.vmem [resolvable:$false] %s408_s3 }
  0x3d   : > { %s410_s4 = scalar_lea.vmem %s409_s3, 256  ;;  %p411_p7 = scmp.lt.s32.totalorder %s629_s26, %s409_s3 }
  0x3e   : > { %p407_p13 = pneg %p406_p12  ;;  %p412_p10 = scmp.lt.s32.totalorder %s410_s4, %s404_s30 }
  0x40   : > { %p413_p2 = por %p412_p10, %p411_p7 }
  0x42   : > { %p414_p4 = pnand %p413_p2, %p407_p13 }
  0xc6   : > { %v138_v4 = vpop.xlane.xlu0 %137 }
  0xc7   : > { %vm139_vm1 = vcmp.eq.f32.partialorder %v134_v0, %v138_v4  ;;  %v157_v33 = vmax.f32 %v138_v4, 0.0 }
  0xc8   : > { %v140_v5 = vsel %vm139_vm1, %v600_v3, 64 }
  0xc9   : > { %v141_v6 = vsel %vm135_vm0, %v140_v5, 2147483647 }
  0xca   : > { %v143_v7 = vshra.s32 %v141_v6, 16  ;;  %v142_v9 = vand.u32 65535, %v141_v6 }
  0xcc   : > { %v145_v8 = vcvt.s32.f32 %v143_v7  ;;  %v144_v11 = vcvt.s32.f32 %v142_v9 }
  0xce   : > { %146 = vmin.xlane.f32.xlu0 %v145_v8 }
 0x15b   : > { %v147_v10 = vpop.xlane.xlu0 %146 }
 0x15c   : > { %vm148_vm2 = vcmp.eq.f32.partialorder %v145_v8, %v147_v10  ;;  %v153_v13 = vcvt.f32.s32 %v147_v10 }
 0x15d   : > { %v149_v12 = vsel %vm148_vm2, %v144_v11, inf }
 0x15e   : > { %150 = vmin.xlane.f32.xlu1 %v149_v12  ;;  %v154_v15 = vshll.u32 %v153_v13, 16 }
 0x1eb   : > { %v151_v14 = vpop.xlane.xlu1 %150 }
 0x1ec   : > { %v152_v16 = vcvt.f32.s32 %v151_v14 }
 0x1ee   : > { %v155_v17 = vadd.s32 %v154_v15, %v152_v16 }
 0x1f0   : > { %vm156_vm3 = vcmp.eq.s32.totalorder %v600_v3, %v155_v17 }
 0x1f1   : > { %v159_v18 = vsel %vm156_vm3, -3.4028235e+38, %v134_v0  ;;  %v158_v36 = vsel %vm156_vm3, %v157_v33, 0.0 }
 0x1f2   : > { %v160_v19 = vsel %vm135_vm0, %v159_v18, -inf }
 0x1f3   : > { %161 = vmax.xlane.f32.xlu1 %v160_v19 }
 0x280   : > { %v162_v20 = vpop.xlane.xlu1 %161 }
 0x281   : > { %vm163_vm4 = vcmp.eq.f32.partialorder %v159_v18, %v162_v20  ;;  %v181_v35 = vmax.f32 %v162_v20, 0.0 }
 0x282   : > { %v164_v21 = vsel %vm163_vm4, %v600_v3, 64 }
 0x283   : > { %v165_v22 = vsel %vm135_vm0, %v164_v21, 2147483647 }
 0x284   : > { %v167_v23 = vshra.s32 %v165_v22, 16  ;;  %v166_v25 = vand.u32 65535, %v165_v22 }
 0x286   : > { %v169_v24 = vcvt.s32.f32 %v167_v23  ;;  %v168_v27 = vcvt.s32.f32 %v166_v25 }
 0x288   : > { %170 = vmin.xlane.f32.xlu0 %v169_v24 }
 0x315   : > { %v171_v26 = vpop.xlane.xlu0 %170 }
 0x316   : > { %vm172_vm5 = vcmp.eq.f32.partialorder %v169_v24, %v171_v26  ;;  %v177_v29 = vcvt.f32.s32 %v171_v26 }
 0x317   : > { %v173_v28 = vsel %vm172_vm5, %v168_v27, inf }
 0x318   : > { %174 = vmin.xlane.f32.xlu1 %v173_v28  ;;  %v178_v31 = vshll.u32 %v177_v29, 16 }
 0x3a5   : > { %v175_v30 = vpop.xlane.xlu1 %174 }
 0x3a6   : > { %v176_v32 = vcvt.f32.s32 %v175_v30 }
 0x3a8   : > { %v179_v34 = vadd.s32 %v178_v31, %v176_v32 }
 0x3aa   : > { %vm180_vm6 = vcmp.eq.s32.totalorder %v600_v3, %v179_v34 }
 0x3ab   : > { %v183_v37 = vsel %vm180_vm6, -3.4028235e+38, %v159_v18  ;;  %v182_v38 = vsel %vm180_vm6, %v181_v35, %v158_v36 }
 0x3ac   : > { %v184_v39 = vsel %vm135_vm0, %v183_v37, -inf }
 0x3ad   : > { %185 = vmax.xlane.f32.xlu0 %v184_v39 }
 0x43a   : > { %v186_v40 = vpop.xlane.xlu0 %185 }
 0x43b   : > { %vm187_vm7 = vcmp.eq.f32.partialorder %v183_v37, %v186_v40  ;;  %v205_v54 = vmax.f32 %v186_v40, 0.0 }
 0x43c   : > { %v188_v41 = vsel %vm187_vm7, %v600_v3, 64 }
 0x43d   : > { %v189_v42 = vsel %vm135_vm0, %v188_v41, 2147483647 }
 0x43e   : > { %v191_v43 = vshra.s32 %v189_v42, 16  ;;  %v190_v45 = vand.u32 65535, %v189_v42 }
 0x440   : > { %v193_v44 = vcvt.s32.f32 %v191_v43  ;;  %v192_v47 = vcvt.s32.f32 %v190_v45 }
 0x442   : > { %194 = vmin.xlane.f32.xlu1 %v193_v44 }
 0x4cf   : > { %v195_v46 = vpop.xlane.xlu1 %194 }
 0x4d0   : > { %vm196_vm8 = vcmp.eq.f32.partialorder %v193_v44, %v195_v46  ;;  %v201_v49 = vcvt.f32.s32 %v195_v46 }
 0x4d1   : > { %v197_v48 = vsel %vm196_vm8, %v192_v47, inf }
 0x4d2   : > { %198 = vmin.xlane.f32.xlu0 %v197_v48  ;;  %v202_v51 = vshll.u32 %v201_v49, 16 }
 0x55f   : > { %v199_v50 = vpop.xlane.xlu0 %198 }
 0x560   : > { %v200_v52 = vcvt.f32.s32 %v199_v50 }
 0x562   : > { %v203_v53 = vadd.s32 %v202_v51, %v200_v52 }
 0x564   : > { %vm204_vm9 = vcmp.eq.s32.totalorder %v600_v3, %v203_v53 }
 0x565   : > { %v207_v55 = vsel %vm204_vm9, -3.4028235e+38, %v183_v37  ;;  %v206_v56 = vsel %vm204_vm9, %v205_v54, %v182_v38 }
 0x566   : > { %v208_v57 = vsel %vm135_vm0, %v207_v55, -inf }
 0x567   : > { %209 = vmax.xlane.f32.xlu1 %v208_v57 }
 0x5f4   : > { %v210_v58 = vpop.xlane.xlu1 %209 }
 0x5f5   : > { %vm211_vm10 = vcmp.eq.f32.partialorder %v207_v55, %v210_v58  ;;  %v229_v9 = vmax.f32 %v210_v58, 0.0 }
 0x5f6   : > { %v212_v59 = vsel %vm211_vm10, %v600_v3, 64 }
 0x5f7   : > { %v213_v60 = vsel %vm135_vm0, %v212_v59, 2147483647 }
 0x5f8   : > { %v215_v61 = vshra.s32 %v213_v60, 16  ;;  %v214_v63 = vand.u32 65535, %v213_v60 }
 0x5fa   : > { %v217_v62 = vcvt.s32.f32 %v215_v61  ;;  %v216_v1 = vcvt.s32.f32 %v214_v63 }
 0x5fc   : > { %218 = vmin.xlane.f32.xlu0 %v217_v62 }
 0x689   : > { %v219_v0 = vpop.xlane.xlu0 %218 }
 0x68a   : > { %vm220_vm11 = vcmp.eq.f32.partialorder %v217_v62, %v219_v0  ;;  %v225_v4 = vcvt.f32.s32 %v219_v0 }
 0x68b   : > { %v221_v2 = vsel %vm220_vm11, %v216_v1, inf }
 0x68c   : > { %222 = vmin.xlane.f32.xlu1 %v221_v2  ;;  %v226_v6 = vshll.u32 %v225_v4, 16 }
 0x719   : > { %v223_v5 = vpop.xlane.xlu1 %222 }
 0x71a   : > { %v224_v7 = vcvt.f32.s32 %v223_v5 }
 0x71c   : > { %v227_v8 = vadd.s32 %v226_v6, %v224_v7 }
 0x71e   : > { %vm228_vm12 = vcmp.eq.s32.totalorder %v600_v3, %v227_v8 }
 0x71f   : > { %v230_v10 = vsel %vm228_vm12, %v229_v9, %v206_v56 }
 0x720   : > { %231 = vst.msk [vmem:[%s131_s25] sm:$0xff] %vm135_vm0, %v230_v10 }
 0x721   : > { %417 = shalt.err (!%p414_p4)
}
 0x722   : > { %s418_s5 = scalar_lea.hbm %s627_s29, 128  ;;  %s422_s14 = scalar_lea.hbm %s673_s1, 256 }
 0x723   : > { %p419_p5 = scmp.ne.s32.totalorder %s627_s29, %s418_s5  ;;  %p423_p0 = scmp.lt.u32.totalorder %s627_s29, %s673_s1 }
 0x724   : > { %p424_p1 = scmp.lt.u32.totalorder %s422_s14, %s418_s5  ;;  %p426_p6 = scmp.lt.u32.totalorder %s418_s5, %s627_s29 }
 0x725   : > { %p420_p8 = pnand %p419_p5, %p682_p11 }
 0x726   : > { %p425_p3 = por %p424_p1, %p423_p0 }
 0x727   : > { %p421_p9 = pneg %p420_p8 }
 0x728   : > { %p427_p12 = por %p426_p6, %p425_p3 }
 0x72a   : > { %p428_p13 = pnand %p427_p12, %p421_p9 }
 0x72c   : > { %431 = shalt.err (!%p428_p13)
}
 0x72d   : > { %330 = dma.vmem_to_hbm [thread:$0]  (%p682_p11), %s629_s26, 128, %s627_s29, %s233_s10  }
 0x72e PF: > { %s258_s21 = sand.u32 1, %s458_s6   ;;  %p683_p7 = scmp.ne.s32.totalorder %s678_s19, 0 }
 0x72f   : > { %p684_p10 = scmp.ge.s32.totalorder %s470_s9, 2  ;;  %s259_s22 = scalar_lea.sflag [#allocation4], %s258_s21 }
 0x731   : > { %p337_p2 = pnand %p684_p10, %p683_p7 }
 0x733   : > { %453 = dma.done.wait (!%p337_p2), %s259_s22, 128  }
 0x734   : > { %455 = vsyncadd (!%p337_p2), %s259_s22, 4294967168  ;;  %p14_p4 = scmp.ge.s32.totalorder %s509_s12, 4   ;;  %s685_s6 = smov %s462_s7 }
 0x735   : > { %s686_s7 = smov %s466_s8  ;;  %s687_s8 = smov %s521_s15 }
 0x736   : > { %s688_s9 = smov %s509_s12  ;;  %16 = sbr.rel (!%p14_p4) target bundleno = 5 (0x5), region = 69 }
 0x73d   :  { %264 = vsyncpa [#allocation3], 1 }
 0x73e   :  { %266 = vsyncpa [#allocation3 + $0x1], 1 }
 0x73f   :  { %267 = vsyncpa [#allocation4], 1 }
 0x740   :  { %269 = vsyncpa [#allocation4 + $0x1], 1 }

</bundles_post_ra>
